<compile_context>
chip_gen: v5e
topology: v5e:2x2
jax: 0.10.0
libtpu: 0.0.40
codegen_flags: <defaults>
</compile_context>

<pallas_src>
import functools

import jax
import jax.numpy as jnp
from jax.experimental import pallas as pl
from jax.experimental.pallas import tpu as pltpu


def saem_kernel(p_ref, x1_ref, x2_ref, wr_ref, out_ref, *, C, inter, HWp):
    """One grid step: `block_batch` samples, whole (padded) spatial extent.

    p_ref   : SMEM (2*inter*C + 2*inter,) f32, packed [w1, b1, w2, b2]
    x1_ref  : VMEM (Nb, C*HWp) io-dtype
    x2_ref  : VMEM (Nb, C*HWp) io-dtype
    wr_ref  : VMEM (1, HWp)    f32   (dim_reduce Conv1d weight, lane-dense)
    out_ref : VMEM (Nb, C*HWp) io-dtype
    """
    x1 = x1_ref[...]                       # (Nb, C*HWp)
    x2 = x2_ref[...]                       # (Nb, C*HWp)
    wr = wr_ref[...]                       # (1, HWp) f32

    # packed-parameter offsets: [w1 (inter*C), b1 (inter), w2 (inter*C), b2 (inter)]
    o_w1 = 0
    o_b1 = inter * C
    o_w2 = o_b1 + inter
    o_b2 = o_w2 + inter * C

    def sigmoid(v):                        # single EUP push (tanh form)
        return 0.5 * jnp.tanh(0.5 * v) + 0.5

    def branch(x, ow, ob):
        # 1x1 conv (+ folded BN) + sigmoid, unrolled over the tiny C / inter
        # dims as scalar*vector FMAs on lane-dense (Nb, HWp) views.  f32
        # accumulation via dtype promotion (weights are f32 SMEM scalars).
        outs = []
        for k in range(inter):
            acc = x[:, 0:HWp] * p_ref[ow + k * C] + p_ref[ob + k]
            for c in range(1, C):
                acc = acc + x[:, c * HWp:(c + 1) * HWp] * p_ref[ow + k * C + c]
            outs.append(sigmoid(acc))      # (Nb, HWp) f32
        return outs

    t1 = branch(x1, o_w1, o_b1)            # inter x (Nb, HWp)
    t2 = branch(x2, o_w2, o_b2)            # inter x (Nb, HWp)

    # aff[n, l] = sum_k t1[k][n, l] * (sum_j t2[k][n, j] * wr[j])
    #           == ((t1 @ t2^T) @ wr)[n, l]  by associativity  (no HWxHW matrix)
    aff = None
    for k in range(inter):
        s_k = jnp.sum(t2[k] * wr, axis=-1, keepdims=True)    # (Nb, 1) lane reduce
        term = t1[k] * s_k                                    # (Nb, HWp)
        aff = term if aff is None else aff + term

    # x1 * Affinity, broadcast over channels as 128-aligned lane copies;
    # single full-width unmasked store.
    pieces = [x1[:, c * HWp:(c + 1) * HWp].astype(jnp.float32) * aff
              for c in range(C)]
    out_ref[...] = jnp.concatenate(pieces, axis=-1).astype(out_ref.dtype)


def spatial_enhance_module(x1_nchw, x2_nchw, params, *, block_batch=None):
    """x1, x2: (N, C, H, W) float32 or bfloat16.  Returns (N, C, H, W), same dtype."""
    N, C, H, W = x1_nchw.shape
    HW = H * W
    eps = 1e-5
    io_dtype = x1_nchw.dtype

    # ---- glue: fold BatchNorm (inference form) into the 1x1 convs ----
    def fold(wc, bc, gamma, beta, mean, var):
        scale = gamma / jnp.sqrt(var + eps)            # (inter,)
        w_eff = wc * scale[:, None]                    # (inter, C)
        b_eff = (bc - mean) * scale + beta             # (inter,)
        return w_eff.astype(jnp.float32), b_eff.astype(jnp.float32)

    w1_eff, b1_eff = fold(params["w1"], params["b1"], params["g1"],
                          params["be1"], params["m1"], params["v1"])
    w2_eff, b2_eff = fold(params["w2"], params["b2"], params["g2"],
                          params["be2"], params["m2"], params["v2"])
    inter = w1_eff.shape[0]

    packed = jnp.concatenate(
        [w1_eff.reshape(-1), b1_eff, w2_eff.reshape(-1), b2_eff]
    ).astype(jnp.float32)                               # (2*inter*C + 2*inter,)

    # ---- glue: NCHW -> (N, C*HWp). Pure reshape when HW % 128 == 0; otherwise
    #      pad HW to a lane multiple (padded lanes meet wr == 0 / x1 == 0, so
    #      the result is unaffected and the pad is sliced off afterwards).
    LANE = 128
    HWp = ((HW + LANE - 1) // LANE) * LANE
    x1_3 = x1_nchw.reshape(N, C, HW)
    x2_3 = x2_nchw.reshape(N, C, HW)
    wr = params["wr"].reshape(HW).astype(jnp.float32)
    if HWp != HW:
        x1_3 = jnp.pad(x1_3, ((0, 0), (0, 0), (0, HWp - HW)))
        x2_3 = jnp.pad(x2_3, ((0, 0), (0, 0), (0, HWp - HW)))
        wr = jnp.pad(wr, (0, HWp - HW))
    x1_2 = x1_3.reshape(N, C * HWp).astype(io_dtype)
    x2_2 = x2_3.reshape(N, C * HWp).astype(io_dtype)
    wr_2 = wr.reshape(1, HWp)

    # ---- block_batch: ~4 MiB per input block; ragged last block via cdiv ----
    itemsize = jnp.dtype(io_dtype).itemsize
    row_bytes = C * HWp * itemsize
    if block_batch is None:
        target = 4 << 20
        rows = max(1, target // row_bytes)
        if rows >= N:
            block_batch = N                 # tiny problem: single grid step
        else:
            block_batch = min(N, max(8, (rows // 8) * 8))  # keep sublane-aligned
    grid = (pl.cdiv(N, block_batch),)

    block_bytes = block_batch * row_bytes
    # 3 blocked arrays x 2 pipeline buffers + wr + margin; keep an explicit
    # limit so enlarged blocks still fit on v5e's 16 MiB scoped default and
    # stay comfortably inside v7x's 64 MiB physical VMEM.
    vmem_needed = 3 * 2 * block_bytes + 2 * HWp * 4 + (1 << 20)
    vmem_limit = int(min(max(vmem_needed, 32 << 20), 48 << 20))

    kernel = functools.partial(saem_kernel, C=C, inter=inter, HWp=HWp)

    grid_spec = pltpu.PrefetchScalarGridSpec(
        num_scalar_prefetch=1,              # packed conv+BN weights land in SMEM
        grid=grid,
        in_specs=[
            pl.BlockSpec((block_batch, C * HWp), lambda b, p: (b, 0)),   # x1
            pl.BlockSpec((block_batch, C * HWp), lambda b, p: (b, 0)),   # x2
            pl.BlockSpec((1, HWp), lambda b, p: (0, 0)),                 # wr (resident)
        ],
        out_specs=pl.BlockSpec((block_batch, C * HWp), lambda b, p: (b, 0)),
    )

    cost = pl.CostEstimate(
        flops=int(N * HWp * (4 * inter * C + 4 * inter + 2 * C)),
        transcendentals=int(2 * inter * N * HWp),
        bytes_accessed=int(3 * N * C * HWp * itemsize + HWp * 4 + packed.size * 4),
    )

    out = pl.pallas_call(
        kernel,
        out_shape=jax.ShapeDtypeStruct((N, C * HWp), io_dtype),
        grid_spec=grid_spec,
        compiler_params=pltpu.CompilerParams(
            dimension_semantics=("parallel",),
            vmem_limit_bytes=vmem_limit),
        cost_estimate=cost,
    )(packed, x1_2, x2_2, wr_2)

    # ---- glue: (N, C*HWp) -> NCHW (pure reshape; slice off pad if any) ----
    if HWp != HW:
        return out.reshape(N, C, HWp)[:, :, :HW].reshape(N, C, H, W)
    return out.reshape(N, C, H, W)


def reference_forward(x1, x2, params):
    """Pure-JAX mirror of the PyTorch forward (NCHW), for verification."""
    N, C, H, W = x1.shape
    HW = H * W
    eps = 1e-5

    def branch(x, w, b, gamma, beta, mean, var):
        y = jnp.einsum("nchw,oc->nohw", x, w) + b[None, :, None, None]
        y = gamma[None, :, None, None] * (y - mean[None, :, None, None]) \
            / jnp.sqrt(var[None, :, None, None] + eps) + beta[None, :, None, None]
        return jax.nn.sigmoid(y)

    inter = params["w1"].shape[0]
    t1 = branch(x1, params["w1"], params["b1"], params["g1"],
                params["be1"], params["m1"], params["v1"]).reshape(N, inter, HW)
    t2 = branch(x2, params["w2"], params["b2"], params["g2"],
                params["be2"], params["m2"], params["v2"]).reshape(N, inter, HW)
    aff = jnp.einsum("nci,ncj->nij", t1, t2)             # (N, HW, HW)
    aff = jnp.einsum("nij,j->ni", aff, params["wr"])     # permute + Conv1d(HW->1)
    aff = aff.reshape(N, 1, H, W)
    return x1 * aff


def _make_params(key, C, inter, HW):
    ks = jax.random.split(key, 13)
    f32 = jnp.float32
    return {
        # T1: Conv2d(C -> inter, 1x1) + BN(inter)
        "w1": 0.1 * jax.random.normal(ks[0], (inter, C), f32),
        "b1": 0.1 * jax.random.normal(ks[1], (inter,), f32),
        "g1": 1.0 + 0.1 * jax.random.normal(ks[2], (inter,), f32),
        "be1": 0.1 * jax.random.normal(ks[3], (inter,), f32),
        "m1": 0.1 * jax.random.normal(ks[4], (inter,), f32),
        "v1": 0.5 + jnp.abs(jax.random.normal(ks[5], (inter,), f32)),
        # T2: Conv2d(C -> inter, 1x1) + BN(inter)
        "w2": 0.1 * jax.random.normal(ks[6], (inter, C), f32),
        "b2": 0.1 * jax.random.normal(ks[7], (inter,), f32),
        "g2": 1.0 + 0.1 * jax.random.normal(ks[8], (inter,), f32),
        "be2": 0.1 * jax.random.normal(ks[9], (inter,), f32),
        "m2": 0.1 * jax.random.normal(ks[10], (inter,), f32),
        "v2": 0.5 + jnp.abs(jax.random.normal(ks[11], (inter,), f32)),
        # dim_reduce: Conv1d(HW -> 1, kernel_size=1, bias=False)
        "wr": 0.05 * jax.random.normal(ks[12], (HW,), f32),
    }


if __name__ == "__main__":
    f32 = jnp.float32
    key = jax.random.PRNGKey(0)

    # ---- test 1: shipped shape (2, 4, 16, 16), f32, single grid step ----
    N, C, H, W = 2, 4, 16, 16
    inter = C // 2                      # inter_channels defaults to in_channels // 2
    kp, k1, k2, kk = jax.random.split(key, 4)
    params = _make_params(kp, C, inter, H * W)
    x1 = jax.random.normal(k1, (N, C, H, W), f32)
    x2 = jax.random.normal(k2, (N, C, H, W), f32)

    out = jax.block_until_ready(spatial_enhance_module(x1, x2, params))
    ref = reference_forward(x1, x2, params)
    assert out.shape == (N, C, H, W)
    assert jnp.allclose(out, ref, rtol=1e-4, atol=1e-4), "f32 mismatch vs reference"

    # ---- test 2: bf16 I/O (halves HBM traffic; f32 accumulation inside) ----
    x1b = x1.astype(jnp.bfloat16)
    x2b = x2.astype(jnp.bfloat16)
    out_bf = jax.block_until_ready(spatial_enhance_module(x1b, x2b, params))
    ref_bf = reference_forward(x1b.astype(f32), x2b.astype(f32), params)
    assert out_bf.dtype == jnp.bfloat16
    assert jnp.allclose(out_bf.astype(f32), ref_bf, rtol=3e-2, atol=3e-2), "bf16 mismatch"

    # ---- test 3: HW not a lane multiple (12x12 -> padded to 256 lanes) ----
    kp3, k13, k23 = jax.random.split(kk, 3)
    params3 = _make_params(kp3, C, inter, 12 * 12)
    x1p = jax.random.normal(k13, (2, C, 12, 12), f32)
    x2p = jax.random.normal(k23, (2, C, 12, 12), f32)
    outp = jax.block_until_ready(spatial_enhance_module(x1p, x2p, params3))
    refp = reference_forward(x1p, x2p, params3)
    assert jnp.allclose(outp, refp, rtol=1e-4, atol=1e-4), "padded-HW mismatch"

    # ---- test 4: ragged batch (N=10, block_batch=8 -> 2 steps, partial last) ----
    kr1, kr2 = jax.random.split(jax.random.PRNGKey(1), 2)
    x1r = jax.random.normal(kr1, (10, C, H, W), f32)
    x2r = jax.random.normal(kr2, (10, C, H, W), f32)
    outr = jax.block_until_ready(
        spatial_enhance_module(x1r, x2r, params, block_batch=8))
    refr = reference_forward(x1r, x2r, params)
    assert jnp.allclose(outr, refr, rtol=1e-4, atol=1e-4), "ragged-batch mismatch"

    print("KERNEL_OK")
</pallas_src>

<mosaic_0001>
module attributes {stable_mosaic.version = 11 : i64} {
  func.func @saem_kernel(%arg0: i32, %arg1: memref<20xf32, #tpu.memory_space<smem>>, %arg2: memref<2x1024xf32, #tpu.memory_space<vmem>>, %arg3: memref<2x1024xf32, #tpu.memory_space<vmem>>, %arg4: memref<1x256xf32, #tpu.memory_space<vmem>>, %arg5: memref<2x1024xf32, #tpu.memory_space<vmem>>) attributes {dimension_semantics = [#tpu.dimension_semantics<parallel>], iteration_bounds = array<i64: 1>, scalar_prefetch = 1 : i64, scratch_operands = 0 : i64, tpu.core_type = #tpu.core_type<tc>, window_params = [{transform_indices = @transform_0, window_bounds = array<i64: 2, 1024>}, {transform_indices = @transform_1, window_bounds = array<i64: 2, 1024>}, {pipeline_mode = #tpu.pipeline_mode<synchronous>, transform_indices = @transform_2, window_bounds = array<i64: 1, 256>}, {transform_indices = @transform_3, window_bounds = array<i64: 2, 1024>}]} {
    %c0 = arith.constant 0 : index
    %c0_0 = arith.constant 0 : index
    %0 = vector.load %arg2[%c0, %c0_0] : memref<2x1024xf32, #tpu.memory_space<vmem>>, vector<2x1024xf32>
    %c0_1 = arith.constant 0 : index
    %c0_2 = arith.constant 0 : index
    %1 = vector.load %arg3[%c0_1, %c0_2] : memref<2x1024xf32, #tpu.memory_space<vmem>>, vector<2x1024xf32>
    %c0_3 = arith.constant 0 : index
    %c0_4 = arith.constant 0 : index
    %2 = vector.load %arg4[%c0_3, %c0_4] : memref<1x256xf32, #tpu.memory_space<vmem>>, vector<1x256xf32>
    %3 = vector.extract_strided_slice %0 {offsets = [0, 0], sizes = [2, 256], strides = [1, 1]} : vector<2x1024xf32> to vector<2x256xf32>
    %c0_5 = arith.constant 0 : index
    %4 = memref.load %arg1[%c0_5] : memref<20xf32, #tpu.memory_space<smem>>
    %5 = vector.broadcast %4 : f32 to vector<2x256xf32>
    %6 = arith.mulf %3, %5 : vector<2x256xf32>
    %c8 = arith.constant 8 : index
    %7 = memref.load %arg1[%c8] : memref<20xf32, #tpu.memory_space<smem>>
    %8 = vector.broadcast %7 : f32 to vector<2x256xf32>
    %9 = arith.addf %6, %8 : vector<2x256xf32>
    %10 = vector.extract_strided_slice %0 {offsets = [0, 256], sizes = [2, 256], strides = [1, 1]} : vector<2x1024xf32> to vector<2x256xf32>
    %c1 = arith.constant 1 : index
    %11 = memref.load %arg1[%c1] : memref<20xf32, #tpu.memory_space<smem>>
    %12 = vector.broadcast %11 : f32 to vector<2x256xf32>
    %13 = arith.mulf %10, %12 : vector<2x256xf32>
    %14 = arith.addf %9, %13 : vector<2x256xf32>
    %15 = vector.extract_strided_slice %0 {offsets = [0, 512], sizes = [2, 256], strides = [1, 1]} : vector<2x1024xf32> to vector<2x256xf32>
    %c2 = arith.constant 2 : index
    %16 = memref.load %arg1[%c2] : memref<20xf32, #tpu.memory_space<smem>>
    %17 = vector.broadcast %16 : f32 to vector<2x256xf32>
    %18 = arith.mulf %15, %17 : vector<2x256xf32>
    %19 = arith.addf %14, %18 : vector<2x256xf32>
    %20 = vector.extract_strided_slice %0 {offsets = [0, 768], sizes = [2, 256], strides = [1, 1]} : vector<2x1024xf32> to vector<2x256xf32>
    %c3 = arith.constant 3 : index
    %21 = memref.load %arg1[%c3] : memref<20xf32, #tpu.memory_space<smem>>
    %22 = vector.broadcast %21 : f32 to vector<2x256xf32>
    %23 = arith.mulf %20, %22 : vector<2x256xf32>
    %24 = arith.addf %19, %23 : vector<2x256xf32>
    %cst = arith.constant 5.000000e-01 : f32
    %25 = vector.broadcast %cst : f32 to vector<2x256xf32>
    %26 = arith.mulf %25, %24 : vector<2x256xf32>
    %27 = math.tanh %26 : vector<2x256xf32>
    %cst_6 = arith.constant 5.000000e-01 : f32
    %28 = vector.broadcast %cst_6 : f32 to vector<2x256xf32>
    %29 = arith.mulf %28, %27 : vector<2x256xf32>
    %cst_7 = arith.constant 5.000000e-01 : f32
    %30 = vector.broadcast %cst_7 : f32 to vector<2x256xf32>
    %31 = arith.addf %29, %30 : vector<2x256xf32>
    %32 = vector.extract_strided_slice %0 {offsets = [0, 0], sizes = [2, 256], strides = [1, 1]} : vector<2x1024xf32> to vector<2x256xf32>
    %c4 = arith.constant 4 : index
    %33 = memref.load %arg1[%c4] : memref<20xf32, #tpu.memory_space<smem>>
    %34 = vector.broadcast %33 : f32 to vector<2x256xf32>
    %35 = arith.mulf %32, %34 : vector<2x256xf32>
    %c9 = arith.constant 9 : index
    %36 = memref.load %arg1[%c9] : memref<20xf32, #tpu.memory_space<smem>>
    %37 = vector.broadcast %36 : f32 to vector<2x256xf32>
    %38 = arith.addf %35, %37 : vector<2x256xf32>
    %39 = vector.extract_strided_slice %0 {offsets = [0, 256], sizes = [2, 256], strides = [1, 1]} : vector<2x1024xf32> to vector<2x256xf32>
    %c5 = arith.constant 5 : index
    %40 = memref.load %arg1[%c5] : memref<20xf32, #tpu.memory_space<smem>>
    %41 = vector.broadcast %40 : f32 to vector<2x256xf32>
    %42 = arith.mulf %39, %41 : vector<2x256xf32>
    %43 = arith.addf %38, %42 : vector<2x256xf32>
    %44 = vector.extract_strided_slice %0 {offsets = [0, 512], sizes = [2, 256], strides = [1, 1]} : vector<2x1024xf32> to vector<2x256xf32>
    %c6 = arith.constant 6 : index
    %45 = memref.load %arg1[%c6] : memref<20xf32, #tpu.memory_space<smem>>
    %46 = vector.broadcast %45 : f32 to vector<2x256xf32>
    %47 = arith.mulf %44, %46 : vector<2x256xf32>
    %48 = arith.addf %43, %47 : vector<2x256xf32>
    %49 = vector.extract_strided_slice %0 {offsets = [0, 768], sizes = [2, 256], strides = [1, 1]} : vector<2x1024xf32> to vector<2x256xf32>
    %c7 = arith.constant 7 : index
    %50 = memref.load %arg1[%c7] : memref<20xf32, #tpu.memory_space<smem>>
    %51 = vector.broadcast %50 : f32 to vector<2x256xf32>
    %52 = arith.mulf %49, %51 : vector<2x256xf32>
    %53 = arith.addf %48, %52 : vector<2x256xf32>
    %cst_8 = arith.constant 5.000000e-01 : f32
    %54 = vector.broadcast %cst_8 : f32 to vector<2x256xf32>
    %55 = arith.mulf %54, %53 : vector<2x256xf32>
    %56 = math.tanh %55 : vector<2x256xf32>
    %cst_9 = arith.constant 5.000000e-01 : f32
    %57 = vector.broadcast %cst_9 : f32 to vector<2x256xf32>
    %58 = arith.mulf %57, %56 : vector<2x256xf32>
    %cst_10 = arith.constant 5.000000e-01 : f32
    %59 = vector.broadcast %cst_10 : f32 to vector<2x256xf32>
    %60 = arith.addf %58, %59 : vector<2x256xf32>
    %61 = vector.extract_strided_slice %1 {offsets = [0, 0], sizes = [2, 256], strides = [1, 1]} : vector<2x1024xf32> to vector<2x256xf32>
    %c10 = arith.constant 10 : index
    %62 = memref.load %arg1[%c10] : memref<20xf32, #tpu.memory_space<smem>>
    %63 = vector.broadcast %62 : f32 to vector<2x256xf32>
    %64 = arith.mulf %61, %63 : vector<2x256xf32>
    %c18 = arith.constant 18 : index
    %65 = memref.load %arg1[%c18] : memref<20xf32, #tpu.memory_space<smem>>
    %66 = vector.broadcast %65 : f32 to vector<2x256xf32>
    %67 = arith.addf %64, %66 : vector<2x256xf32>
    %68 = vector.extract_strided_slice %1 {offsets = [0, 256], sizes = [2, 256], strides = [1, 1]} : vector<2x1024xf32> to vector<2x256xf32>
    %c11 = arith.constant 11 : index
    %69 = memref.load %arg1[%c11] : memref<20xf32, #tpu.memory_space<smem>>
    %70 = vector.broadcast %69 : f32 to vector<2x256xf32>
    %71 = arith.mulf %68, %70 : vector<2x256xf32>
    %72 = arith.addf %67, %71 : vector<2x256xf32>
    %73 = vector.extract_strided_slice %1 {offsets = [0, 512], sizes = [2, 256], strides = [1, 1]} : vector<2x1024xf32> to vector<2x256xf32>
    %c12 = arith.constant 12 : index
    %74 = memref.load %arg1[%c12] : memref<20xf32, #tpu.memory_space<smem>>
    %75 = vector.broadcast %74 : f32 to vector<2x256xf32>
    %76 = arith.mulf %73, %75 : vector<2x256xf32>
    %77 = arith.addf %72, %76 : vector<2x256xf32>
    %78 = vector.extract_strided_slice %1 {offsets = [0, 768], sizes = [2, 256], strides = [1, 1]} : vector<2x1024xf32> to vector<2x256xf32>
    %c13 = arith.constant 13 : index
    %79 = memref.load %arg1[%c13] : memref<20xf32, #tpu.memory_space<smem>>
    %80 = vector.broadcast %79 : f32 to vector<2x256xf32>
    %81 = arith.mulf %78, %80 : vector<2x256xf32>
    %82 = arith.addf %77, %81 : vector<2x256xf32>
    %cst_11 = arith.constant 5.000000e-01 : f32
    %83 = vector.broadcast %cst_11 : f32 to vector<2x256xf32>
    %84 = arith.mulf %83, %82 : vector<2x256xf32>
    %85 = math.tanh %84 : vector<2x256xf32>
    %cst_12 = arith.constant 5.000000e-01 : f32
    %86 = vector.broadcast %cst_12 : f32 to vector<2x256xf32>
    %87 = arith.mulf %86, %85 : vector<2x256xf32>
    %cst_13 = arith.constant 5.000000e-01 : f32
    %88 = vector.broadcast %cst_13 : f32 to vector<2x256xf32>
    %89 = arith.addf %87, %88 : vector<2x256xf32>
    %90 = vector.extract_strided_slice %1 {offsets = [0, 0], sizes = [2, 256], strides = [1, 1]} : vector<2x1024xf32> to vector<2x256xf32>
    %c14 = arith.constant 14 : index
    %91 = memref.load %arg1[%c14] : memref<20xf32, #tpu.memory_space<smem>>
    %92 = vector.broadcast %91 : f32 to vector<2x256xf32>
    %93 = arith.mulf %90, %92 : vector<2x256xf32>
    %c19 = arith.constant 19 : index
    %94 = memref.load %arg1[%c19] : memref<20xf32, #tpu.memory_space<smem>>
    %95 = vector.broadcast %94 : f32 to vector<2x256xf32>
    %96 = arith.addf %93, %95 : vector<2x256xf32>
    %97 = vector.extract_strided_slice %1 {offsets = [0, 256], sizes = [2, 256], strides = [1, 1]} : vector<2x1024xf32> to vector<2x256xf32>
    %c15 = arith.constant 15 : index
    %98 = memref.load %arg1[%c15] : memref<20xf32, #tpu.memory_space<smem>>
    %99 = vector.broadcast %98 : f32 to vector<2x256xf32>
    %100 = arith.mulf %97, %99 : vector<2x256xf32>
    %101 = arith.addf %96, %100 : vector<2x256xf32>
    %102 = vector.extract_strided_slice %1 {offsets = [0, 512], sizes = [2, 256], strides = [1, 1]} : vector<2x1024xf32> to vector<2x256xf32>
    %c16 = arith.constant 16 : index
    %103 = memref.load %arg1[%c16] : memref<20xf32, #tpu.memory_space<smem>>
    %104 = vector.broadcast %103 : f32 to vector<2x256xf32>
    %105 = arith.mulf %102, %104 : vector<2x256xf32>
    %106 = arith.addf %101, %105 : vector<2x256xf32>
    %107 = vector.extract_strided_slice %1 {offsets = [0, 768], sizes = [2, 256], strides = [1, 1]} : vector<2x1024xf32> to vector<2x256xf32>
    %c17 = arith.constant 17 : index
    %108 = memref.load %arg1[%c17] : memref<20xf32, #tpu.memory_space<smem>>
    %109 = vector.broadcast %108 : f32 to vector<2x256xf32>
    %110 = arith.mulf %107, %109 : vector<2x256xf32>
    %111 = arith.addf %106, %110 : vector<2x256xf32>
    %cst_14 = arith.constant 5.000000e-01 : f32
    %112 = vector.broadcast %cst_14 : f32 to vector<2x256xf32>
    %113 = arith.mulf %112, %111 : vector<2x256xf32>
    %114 = math.tanh %113 : vector<2x256xf32>
    %cst_15 = arith.constant 5.000000e-01 : f32
    %115 = vector.broadcast %cst_15 : f32 to vector<2x256xf32>
    %116 = arith.mulf %115, %114 : vector<2x256xf32>
    %cst_16 = arith.constant 5.000000e-01 : f32
    %117 = vector.broadcast %cst_16 : f32 to vector<2x256xf32>
    %118 = arith.addf %116, %117 : vector<2x256xf32>
    %119 = vector.broadcast %2 : vector<1x256xf32> to vector<2x256xf32>
    %120 = arith.mulf %89, %119 : vector<2x256xf32>
    %cst_17 = arith.constant dense<0.000000e+00> : vector<2xf32>
    %121 = vector.multi_reduction <add>, %120, %cst_17 [1] : vector<2x256xf32> to vector<2xf32>
    %122 = vector.shape_cast %121 : vector<2xf32> to vector<2x1xf32>
    %123 = vector.broadcast %122 : vector<2x1xf32> to vector<2x256xf32>
    %124 = arith.mulf %31, %123 : vector<2x256xf32>
    %125 = vector.broadcast %2 : vector<1x256xf32> to vector<2x256xf32>
    %126 = arith.mulf %118, %125 : vector<2x256xf32>
    %cst_18 = arith.constant dense<0.000000e+00> : vector<2xf32>
    %127 = vector.multi_reduction <add>, %126, %cst_18 [1] : vector<2x256xf32> to vector<2xf32>
    %128 = vector.shape_cast %127 : vector<2xf32> to vector<2x1xf32>
    %129 = vector.broadcast %128 : vector<2x1xf32> to vector<2x256xf32>
    %130 = arith.mulf %60, %129 : vector<2x256xf32>
    %131 = arith.addf %124, %130 : vector<2x256xf32>
    %132 = vector.extract_strided_slice %0 {offsets = [0, 0], sizes = [2, 256], strides = [1, 1]} : vector<2x1024xf32> to vector<2x256xf32>
    %133 = arith.mulf %132, %131 : vector<2x256xf32>
    %134 = vector.extract_strided_slice %0 {offsets = [0, 256], sizes = [2, 256], strides = [1, 1]} : vector<2x1024xf32> to vector<2x256xf32>
    %135 = arith.mulf %134, %131 : vector<2x256xf32>
    %136 = vector.extract_strided_slice %0 {offsets = [0, 512], sizes = [2, 256], strides = [1, 1]} : vector<2x1024xf32> to vector<2x256xf32>
    %137 = arith.mulf %136, %131 : vector<2x256xf32>
    %138 = vector.extract_strided_slice %0 {offsets = [0, 768], sizes = [2, 256], strides = [1, 1]} : vector<2x1024xf32> to vector<2x256xf32>
    %139 = arith.mulf %138, %131 : vector<2x256xf32>
    %140 = tpu.concatenate %133, %135, %137, %139 in 1 : vector<2x256xf32>, vector<2x256xf32>, vector<2x256xf32>, vector<2x256xf32> -> vector<2x1024xf32>
    %c0_19 = arith.constant 0 : index
    %c0_20 = arith.constant 0 : index
    %141 = vector.load %arg5[%c0_19, %c0_20] : memref<2x1024xf32, #tpu.memory_space<vmem>>, vector<2x1024xf32>
    tpu.vector_store %arg5[%c0_19, %c0_20], %140 {strides = array<i32>} : memref<2x1024xf32, #tpu.memory_space<vmem>>, vector<2x1024xf32>,
    return
  }
  func.func @transform_0(%arg0: i32, %arg1: memref<20xf32, #tpu.memory_space<smem>>) -> (i32, i32) {
    %c0_i32 = arith.constant 0 : i32
    %c0_i32_0 = arith.constant 0 : i32
    return %arg0, %c0_i32 : i32, i32
  }
  func.func @transform_1(%arg0: i32, %arg1: memref<20xf32, #tpu.memory_space<smem>>) -> (i32, i32) {
    %c0_i32 = arith.constant 0 : i32
    %c0_i32_0 = arith.constant 0 : i32
    return %arg0, %c0_i32 : i32, i32
  }
  func.func @transform_2(%arg0: i32, %arg1: memref<20xf32, #tpu.memory_space<smem>>) -> (i32, i32) {
    %c0_i32 = arith.constant 0 : i32
    %c0_i32_0 = arith.constant 0 : i32
    %c0_i32_1 = arith.constant 0 : i32
    return %c0_i32, %c0_i32_0 : i32, i32
  }
  func.func @transform_3(%arg0: i32, %arg1: memref<20xf32, #tpu.memory_space<smem>>) -> (i32, i32) {
    %c0_i32 = arith.constant 0 : i32
    %c0_i32_0 = arith.constant 0 : i32
    return %arg0, %c0_i32 : i32, i32
  }
}

</mosaic_0001>

<bundles_post_ra>
// kernel: tpu_custom_call.1
= control target key start
LH: loop header
LB: loop body
LE: loop exit
PB: predicated region body
PF: predicated region fallthrough
CT: control target
= control target key end

     0   :  { %s383_s18 = smov [#allocation3]   ;;  %s439_s0 = inlined_call_operand.hbm [shape: f32[20], index: 0, kind: input, shape index: {}]   ;;  %s440_s1 = inlined_call_operand.hbm [shape: f32[2,1024], index: 1, kind: input, shape index: {}]   ;;  %s441_s2 = inlined_call_operand.hbm [shape: f32[2,1024], index: 2, kind: input, shape index: {}]   ;;  %s442_s3 = inlined_call_operand.vmem [shape: f32[1,256], index: 3, kind: input, shape index: {}]   ;;  %s443_s4 = inlined_call_operand.hbm [shape: f32[2,1024], index: 4, kind: output, shape index: {}]  }
   0x1   :  { %s10_s17 = sshll.u32 %s439_s0, 4  ;;  %s11_s17 = int_to_ptr.hbm [resolvable:$true] %s10_s17 }
   0x2   :  { %13 = dma.hbm_to_smem %s11_s17, 16, %s383_s18, [#allocation2] }
   0x3   :  { %375 = dma.done.wait [#allocation2], 16 }
   0x4   :  { %376 = vsyncadd [#allocation2], 4294967280 }
   0x5   :  { %16 = sfence }
   0x6   :  { %17 = vsyncpa [#allocation5], 0 }
   0x7   :  { %18 = vsyncpa [#allocation8], 0 }
   0x8   :  { %19 = vsyncpa [#allocation6], 0  ;;  %s25_s21 = sshll.u32 %s440_s1, 4  ;;  %s384_s22 = smov [#allocation4]   ;;  %s26_s21 = int_to_ptr.hbm [resolvable:$true] %s25_s21 }
   0x9   :  { %s27_s23 = sshll.u32 %s384_s22, 4  ;;  %s36_s0 = sshll.u32 %s441_s2, 4  ;;  %s28_s23 = int_to_ptr.vmem [resolvable:$true] %s27_s23  ;;  %s37_s0 = int_to_ptr.hbm [resolvable:$true] %s36_s0 }
   0xa   :  { %30 = dma.hbm_to_vmem [thread:$0]  %s26_s21, 256, %s28_s23, [#allocation5]  }
   0xb   :  { %s385_s26 = smov [#allocation7]  }
   0xc   :  { %s38_s27 = sshll.u32 %s385_s26, 4  ;;  %s39_s27 = int_to_ptr.vmem [resolvable:$true] %s38_s27 }
   0xd   :  { %41 = dma.hbm_to_vmem [thread:$0]  %s37_s0, 256, %s39_s27, [#allocation8]  }
   0xe   :  { %377 = dma.done.wait [#allocation5], 256  }
   0xf   :  { %378 = vsyncadd [#allocation5], 4294967040 }
  0x10   :  { %379 = dma.done.wait [#allocation8], 256  }
  0x11   :  { %380 = vsyncadd [#allocation8], 4294967040  ;;  %s268_s28 = sld [smem:[#allocation3 + $0xa]]  ;;  %v54_v0 = vld [vmem:[#allocation7] sm:$0xff]  ;;  %v55_v1 = vld [vmem:[#allocation7 + $0x8] sm:$0xff]  ;;  %vm161_vm0 = vcmask 1041408  }
  0x12   :  { %s269_s1 = sld [smem:[#allocation3 + $0x12]]  ;;  %v116_v5 = vrot.slane %v54_v0, 4  ;;  %v127_v6 = vrot.slane %v55_v1, 4  ;;  %v56_v26 = vld [vmem:[%s442_s3] sm:$0x3]  ;;  %v52_v56 = vld [vmem:[#allocation4] sm:$0xff] }
  0x13   :  { %s270_s29 = sld [smem:[#allocation3 + $0xb]]  ;;  %v159_v31 = vperm.slane %v56_v26, 1  ;;  %v158_v34 = vperm.slane %v56_v26, 0  ;;  %v66_v59 = vrot.slane %v52_v56, 4  ;;  %vm230_vm1 = vcmask 1045508   ;;  %s387_s21 = smov [#allocation9]  }
  0x14   :  { %s271_s30 = sld [smem:[#allocation3 + $0xc]]  ;;  %vm232_vm2 = vcmask 1043456   ;;  %s246_s22 = sshll.u32 %s387_s21, 4  ;;  %s247_s22 = int_to_ptr.vmem [resolvable:$true] %s246_s22 }
  0x15   :  { %s272_s5 = sld [smem:[#allocation3 + $0xd]]  ;;  %v160_v35 = vrot.slane %v159_v31, 6  ;;  %s248_s25 = sshll.u32 %s443_s4, 4  ;;  %s249_s25 = int_to_ptr.hbm [resolvable:$true] %s248_s25 }
  0x16   :  { %s273_s6 = sld [smem:[#allocation3 + $0xe]] }
  0x17   :  { %v108_v2 = vstv %s268_s28  ;;  %s274_s2 = sld [smem:[#allocation3 + $0x13]]  ;;  %v162_v38 = vsel %vm161_vm0, %v158_v34, %v160_v35 }
  0x18   :  { %v109_v3 = vmul.f32 %v108_v2, %v54_v0  ;;  %v111_v4 = vstv %s269_s1  ;;  %s275_s7 = sld [smem:[#allocation3 + $0xf]] }
  0x19   :  { %v114_v7 = vstv %s270_s29  ;;  %s276_s8 = sld [smem:[#allocation3 + $0x10]] }
  0x1a   :  { %v112_v8 = vadd.f32 %v111_v4, %v109_v3  ;;  %v118_v9 = vmul.f32 %v116_v5, %v114_v7  ;;  %v121_v10 = vstv %s271_s30  ;;  %s277_s9 = sld [smem:[#allocation3 + $0x11]]  ;;  %v53_v4 = vld [vmem:[#allocation4 + $0x8] sm:$0xff] }
  0x1b   :  { %v122_v11 = vmul.f32 %v121_v10, %v55_v1  ;;  %v125_v12 = vstv %s272_s5  ;;  %s57_s3 = sld [smem:[#allocation3]]  ;;  %v77_v10 = vrot.slane %v53_v4, 4 }
  0x1c   :  { %v119_v13 = vadd.f32 %v118_v9, %v112_v8  ;;  %v129_v14 = vmul.f32 %v127_v6, %v125_v12  ;;  %v136_v15 = vstv %s273_s6  ;;  %s263_s12 = sld [smem:[#allocation3 + $0x4]] }
  0x1d   :  { %v137_v16 = vmul.f32 %v136_v15, %v54_v0  ;;  %v139_v17 = vstv %s274_s2  ;;  %s259_s13 = sld [smem:[#allocation3 + $0x8]] }
  0x1e   :  { %v123_v18 = vadd.f32 %v122_v11, %v119_v13  ;;  %v142_v19 = vstv %s275_s7  ;;  %s260_s14 = sld [smem:[#allocation3 + $0x1]] }
  0x1f   :  { %v140_v20 = vadd.f32 %v139_v17, %v137_v16  ;;  %v143_v21 = vmul.f32 %v142_v19, %v116_v5  ;;  %v146_v22 = vstv %s276_s8  ;;  %s264_s15 = sld [smem:[#allocation3 + $0x9]] }
  0x20   :  { %v130_v23 = vadd.f32 %v129_v14, %v123_v18  ;;  %v147_v24 = vmul.f32 %v146_v22, %v55_v1  ;;  %v150_v25 = vstv %s277_s9  ;;  %s265_s16 = sld [smem:[#allocation3 + $0x5]] }
  0x21   :  { %v144_v27 = vadd.f32 %v143_v21, %v140_v20  ;;  %v151_v28 = vmul.f32 %v150_v25, %v127_v6  ;;  %v58_v55 = vstv %s57_s3  ;;  %s261_s17 = sld [smem:[#allocation3 + $0x2]] }
  0x22   :  { %v131_v29 = vmul.f32 0.5, %v130_v23  ;;  %v86_v57 = vstv %s263_s12  ;;  %s266_s18 = sld [smem:[#allocation3 + $0x6]]  ;;  %v59_v58 = vmul.f32 %v58_v55, %v52_v56 }
  0x23   :  { %v148_v30 = vadd.f32 %v147_v24, %v144_v27  ;;  %v61_v60 = vstv %s259_s13  ;;  %s262_s19 = sld [smem:[#allocation3 + $0x3]]  ;;  %v87_v62 = vmul.f32 %v86_v57, %v52_v56  ;;  %v386_v24 = vmov 269488144  }
  0x24   :  { %283 = vtanh.f32 %v131_v29  ;;  %v64_v61 = vstv %s260_s14  ;;  %s267_s20 = sld [smem:[#allocation3 + $0x7]]  ;;  %v62_v1 = vadd.f32 %v61_v60, %v59_v58  ;;  %v178_v25 = vunpack.c.l.s4 %v386_v24 }
  0x25   :  { %v152_v32 = vadd.f32 %v151_v28, %v148_v30  ;;  %v89_v63 = vstv %s264_s15  ;;  %v68_v2 = vmul.f32 %v66_v59, %v64_v61 }
  0x26   :  { %v92_v0 = vstv %s265_s16  ;;  %v90_v5 = vadd.f32 %v89_v63, %v87_v62  ;;  %v179_v28 = vunpack.c.0.s8 %v178_v25 }
  0x27   :  { %v153_v33 = vmul.f32 0.5, %v152_v32  ;;  %v71_v3 = vstv %s261_s17  ;;  %v93_v6 = vmul.f32 %v92_v0, %v66_v59  ;;  %v69_v8 = vadd.f32 %v68_v2, %v62_v1 }
  0x28   :  { %v96_v7 = vstv %s266_s18  ;;  %v72_v9 = vmul.f32 %v71_v3, %v53_v4 }
  0x29   :  { %285 = vtanh.f32 %v153_v33  ;;  %v75_v11 = vstv %s262_s19  ;;  %v94_v12 = vadd.f32 %v93_v6, %v90_v5  ;;  %v97_v13 = vmul.f32 %v96_v7, %v53_v4 }
  0x2a   :  { %v284_v36 = vpop.eup %283  ;;  %v100_v14 = vstv %s267_s20  ;;  %v73_v15 = vadd.f32 %v72_v9, %v69_v8  ;;  %v79_v16 = vmul.f32 %v77_v10, %v75_v11 }
  0x2b   :  { %v133_v37 = vmul.f32 0.5, %v284_v36  ;;  %v98_v17 = vadd.f32 %v97_v13, %v94_v12  ;;  %v101_v18 = vmul.f32 %v100_v14, %v77_v10 }
  0x2c   :  { %v80_v19 = vadd.f32 %v79_v16, %v73_v15 }
  0x2d   :  { %v134_v39 = vadd.f32 0.5, %v133_v37  ;;  %v102_v20 = vadd.f32 %v101_v18, %v98_v17 }
  0x2e   :  { %v81_v21 = vmul.f32 0.5, %v80_v19 }
  0x2f   :  { %v286_v40 = vpop.eup %285  ;;  %v164_v41 = vmul.f32 %v162_v38, %v134_v39  ;;  %v103_v22 = vmul.f32 0.5, %v102_v20 }
  0x30   :  { %v155_v42 = vmul.f32 0.5, %v286_v40  ;;  %287 = vtanh.f32 %v81_v21 }
  0x31   :  { %166 = vst [vmem:[#allocation1] ss:$4 sm:$0xff] %v164_v41  ;;  %289 = vtanh.f32 %v103_v22 }
  0x32   :  { %v156_v43 = vadd.f32 0.5, %v155_v42 }
  0x34   :  { %v183_v44 = vmul.f32 %v162_v38, %v156_v43 }
  0x36   :  { %v288_v23 = vpop.eup %287 }
  0x37   :  { %v290_v26 = vpop.eup %289  ;;  %v83_v29 = vmul.f32 0.5, %v288_v23 }
  0x38   :  { %v167_v45 = vld.sshfl [vmem:[#allocation1] sm:$0xff pattern:$0x73625140]  ;;  %v168_v46 = vld.sshfl [vmem:[#allocation1 + $0x8] sm:$0xff pattern:$0x73625140] }
  0x39   :  { %v171_v47 = vsel %vm161_vm0, %v167_v45, 0.0  ;;  %v172_v48 = vsel %vm161_vm0, %v168_v46, 0.0  ;;  %185 = vst [vmem:[#allocation1] ss:$4 sm:$0xff] %v183_v44  ;;  %v105_v30 = vmul.f32 0.5, %v290_v26  ;;  %v84_v31 = vadd.f32 0.5, %v83_v29 }
  0x3a   :  { %v173_v49 = vadd.f32 %v172_v48, %v171_v47 }
  0x3b   :  { %v106_v33 = vadd.f32 0.5, %v105_v30 }
  0x3c   :  { %174 = vadd.xlane.f32.xlu0 %v173_v49 }
  0x40   :  { %v186_v50 = vld.sshfl [vmem:[#allocation1] sm:$0xff pattern:$0x73625140]  ;;  %v187_v51 = vld.sshfl [vmem:[#allocation1 + $0x8] sm:$0xff pattern:$0x73625140] }
  0x41   :  { %v190_v52 = vsel %vm161_vm0, %v186_v50, 0.0  ;;  %v191_v53 = vsel %vm161_vm0, %v187_v51, 0.0 }
  0x42   :  { %v192_v54 = vadd.f32 %v191_v53, %v190_v52 }
  0x44   :  { %193 = vadd.xlane.f32.xlu0 %v192_v54 }
  0xaf   :  { %v175_v27 = vpop.xlane.xlu0 %174 }
  0xb0   :  { %v180_v32 = vperm.slane %v175_v27, %v179_v28 }
  0xb2   :  { %v182_v36 = vmul.f32 %v180_v32, %v84_v31 }
  0xb7   :  { %v194_v34 = vpop.xlane.xlu0 %193 }
  0xb8   :  { %v199_v35 = vperm.slane %v194_v34, %v179_v28 }
  0xba   :  { %v201_v37 = vmul.f32 %v199_v35, %v106_v33 }
  0xbc   :  { %v202_v38 = vadd.f32 %v201_v37, %v182_v36 }
  0xbe   :  { %v203_v39 = vmul.f32 %v202_v38, %v52_v56  ;;  %v204_v40 = vmul.f32 %v202_v38, %v66_v59  ;;  %v205_v43 = vmul.f32 %v202_v38, %v53_v4  ;;  %v206_v52 = vmul.f32 %v202_v38, %v77_v10 }
  0xc0   :  { %208 = vst [vmem:[#allocation1] ss:$4 sm:$0xff] %v203_v39 }
  0xc7   :  { %v209_v41 = vld.sshfl [vmem:[#allocation1] sm:$0xff pattern:$0x73625140]  ;;  %v210_v42 = vld.sshfl [vmem:[#allocation1 + $0x8] sm:$0xff pattern:$0x73625140] }
  0xc8   :  { %212 = vst [vmem:[#allocation1] ss:$4 sm:$0xff] %v204_v40  ;;  %v223_v44 = vrot.slane %v210_v42, 6 }
  0xca   :  { %v229_v49 = vsel %vm161_vm0, %v209_v41, %v223_v44 }
  0xcf   :  { %v213_v45 = vld.sshfl [vmem:[#allocation1] sm:$0xff pattern:$0x73625140]  ;;  %v214_v46 = vld.sshfl [vmem:[#allocation1 + $0x8] sm:$0xff pattern:$0x73625140] }
  0xd0   :  { %216 = vst [vmem:[#allocation1] ss:$4 sm:$0xff] %v205_v43  ;;  %v224_v47 = vrot.slane %v213_v45, 4  ;;  %v225_v48 = vrot.slane %v214_v46, 2 }
  0xd2   :  { %v231_v50 = vsel %vm230_vm1, %v224_v47, %v225_v48 }
  0xd3   :  { %v233_v51 = vsel %vm232_vm2, %v229_v49, %v231_v50 }
  0xd4   :  { %239 = vst [vmem:[#allocation9] sm:$0xff] %v233_v51 }
  0xd7   :  { %v217_v53 = vld.sshfl [vmem:[#allocation1] sm:$0xff pattern:$0x73625140]  ;;  %v218_v54 = vld.sshfl [vmem:[#allocation1 + $0x8] sm:$0xff pattern:$0x73625140] }
  0xd8   :  { %220 = vst [vmem:[#allocation1] ss:$4 sm:$0xff] %v206_v52  ;;  %v226_v55 = vrot.slane %v218_v54, 6 }
  0xda   :  { %v234_v60 = vsel %vm161_vm0, %v217_v53, %v226_v55 }
  0xdf   :  { %v221_v56 = vld.sshfl [vmem:[#allocation1] sm:$0xff pattern:$0x73625140]  ;;  %v222_v57 = vld.sshfl [vmem:[#allocation1 + $0x8] sm:$0xff pattern:$0x73625140] }
  0xe0   :  { %v227_v58 = vrot.slane %v221_v56, 4  ;;  %v228_v59 = vrot.slane %v222_v57, 2 }
  0xe2   :  { %v235_v61 = vsel %vm230_vm1, %v227_v58, %v228_v59 }
  0xe3   :  { %v236_v62 = vsel %vm232_vm2, %v234_v60, %v235_v61 }
  0xe4   :  { %240 = vst [vmem:[#allocation9 + $0x8] sm:$0xff] %v236_v62 }
  0xe5   :  { %251 = dma.vmem_to_hbm [thread:$0]  %s247_s22, 256, %s249_s25, [#allocation6]  }
  0xe6   :  { %381 = dma.done.wait [#allocation6], 256  }
  0xe7   :  { %382 = vsyncadd [#allocation6], 4294967040 }
  0xe8   :  { %256 = vsyncpa [#allocation5], 1 }
  0xe9   :  { %257 = vsyncpa [#allocation8], 1 }
  0xea   :  { %258 = vsyncpa [#allocation6], 1 }

</bundles_post_ra>
